<compile_context>
chip_gen: v7x
topology: tpu7x:2x2x1
jax: 0.10.0
libtpu: 0.0.40
codegen_flags: <defaults>
</compile_context>

<pallas_src>
import functools

import jax
import jax.numpy as jnp
from jax.experimental import pallas as pl
from jax.experimental.pallas import tpu as pltpu


def _round_up(x, m):
    return ((x + m - 1) // m) * m


def _next_pow2(x):
    return 1 << max(0, (x - 1).bit_length())


def _hindsight_kernel(out_ref, lab_ref, e_ref, loss_ref, ysum_ref, acc_ref, *,
                      num_maps, num_maps_padded):
    """One grid step: accumulate per-lane BCE sums + label sum; finalize last."""
    k = pl.program_id(0)

    @pl.when(k == 0)
    def _init():
        acc_ref[...] = jnp.zeros_like(acc_ref)
        ysum_ref[...] = jnp.zeros_like(ysum_ref)
        loss_ref[...] = jnp.zeros_like(loss_ref)

    p = out_ref[...].astype(jnp.float32)           # (tr, 128) probabilities
    lab = lab_ref[...].astype(jnp.float32)         # (tr, 128 // P_pad) binary labels
    # Expand compact labels to one label per (node, map) element:
    #   y[r, l] = lab[r, l // P_pad]   (E[i, l] = 1 iff l // P_pad == i; MXU idle)
    y = jnp.dot(lab, e_ref[...], preferred_element_type=jnp.float32)  # (tr, 128)

    # Binary-label BCE with a single log per element (PyTorch clamps log >= -100).
    q = jnp.where(y > 0.5, p, 1.0 - p)
    nll = -jnp.maximum(jnp.log(q), -100.0)         # unweighted BCE, (tr, 128)

    acc_ref[...] += jnp.sum(nll, axis=0, keepdims=True)   # per-lane sums (1, 128)
    ysum_ref[...] += jnp.sum(lab, keepdims=True)          # running sum(labels) (1, 1)

    @pl.when(k == pl.num_programs(0) - 1)
    def _finalize():
        # Tree-fold lanes with equal (lane % P_pad): after log2(npr) XLU rolls,
        # lanes 0..P_pad-1 hold the per-probmap sums  Sum_n nll[n, p].
        folded = acc_ref[...]                       # (1, 128)
        shift = 64
        while shift >= num_maps_padded:
            folded = folded + pltpu.roll(folded, shift=shift, axis=1)
            shift //= 2
        lane = jax.lax.broadcasted_iota(jnp.int32, (1, 128), 1)
        folded = jnp.where(lane < num_maps, folded, jnp.inf)   # drop padded maps
        # loss = min_p [ (N/sum_y) * (1/N) * Sum_n nll ] = min_p(Sum_n nll) / sum_y
        # (== nn.BCELoss(weight=[N/sum(labels)]) -> mean over nodes -> min).
        loss_ref[...] = jnp.min(folded, axis=1, keepdims=True) / ysum_ref[...]


def hindsight_bce_min(output, labels, *, block_rows=2048):
    """output: (N, P) probabilities in (0,1); labels: (N,) binary {0,1}.

    Returns (min_p mean_n weighted_bce, sum(labels)) as f32 scalars.
    """
    N, P = output.shape
    if P > 128:
        # TODO(synk): probmap counts > 128 need a lanes-per-map layout instead
        # of the interleaved flatten used here.
        raise NotImplementedError("hindsight_bce_min requires probmaps <= 128")

    # Pad the map axis to a power of two (divides 128) so the flattened layout
    # keeps map index == lane % P_pad; padded maps are masked out of the min.
    P_pad = _next_pow2(P)
    if P_pad != P:
        output = jnp.pad(output, ((0, 0), (0, P_pad - P)), constant_values=0.5)
    npr = 128 // P_pad                              # nodes per 128-lane row

    labels_f = labels.astype(jnp.float32).reshape(-1)

    # Row tiling: R rows of 128 lanes; pad N with p=0 / y=0 rows (zero BCE and
    # zero label-sum contribution; the final formula divides by sum(labels),
    # not N, so padding is exactly neutral).
    rows_min = -(-N // npr)
    tr = min(_round_up(block_rows, 8), _round_up(rows_min, 8))  # mult of 8 sublanes
    R = _round_up(rows_min, tr)
    n_pad = R * npr - N
    if n_pad:
        output = jnp.pad(output, ((0, n_pad), (0, 0)))
        labels_f = jnp.pad(labels_f, (0, n_pad))

    out_flat = output.reshape(R, 128)               # contiguous reshape
    lab_rows = labels_f.reshape(R, npr)

    # Constant selector: E[i, l] = 1 iff l // P_pad == i (expands labels along lanes).
    sel = (jax.lax.broadcasted_iota(jnp.int32, (npr, 128), 1) // P_pad
           == jax.lax.broadcasted_iota(jnp.int32, (npr, 128), 0)).astype(jnp.float32)

    kernel = functools.partial(_hindsight_kernel, num_maps=P,
                               num_maps_padded=P_pad)
    cost = pl.CostEstimate(
        flops=6 * R * 128,
        transcendentals=R * 128,
        bytes_accessed=R * 128 * 4 + R * npr * 4 + npr * 128 * 4 + 8,
    )
    loss, ysum = pl.pallas_call(
        kernel,
        out_shape=(jax.ShapeDtypeStruct((1, 1), jnp.float32),
                   jax.ShapeDtypeStruct((1, 1), jnp.float32)),
        grid_spec=pltpu.PrefetchScalarGridSpec(
            num_scalar_prefetch=0,
            grid=(R // tr,),
            in_specs=[
                pl.BlockSpec((tr, 128), lambda k: (k, 0)),
                pl.BlockSpec((tr, npr), lambda k: (k, 0)),
                pl.BlockSpec((npr, 128), lambda k: (0, 0)),   # resident, one DMA
            ],
            out_specs=(pl.BlockSpec((1, 1), lambda k: (0, 0)),
                       pl.BlockSpec((1, 1), lambda k: (0, 0))),
            scratch_shapes=[pltpu.VMEM((1, 128), jnp.float32)],
        ),
        compiler_params=pltpu.CompilerParams(
            dimension_semantics=("arbitrary",)),
        cost_estimate=cost,
    )(out_flat, lab_rows, sel)
    return loss[0, 0], ysum[0, 0]


def hindsight_loss(output, labels, A, problem="lscp"):
    """Mirror of HindsightLoss.forward. Returns (loss, greedy_upper_bounds)."""
    del A, problem  # only used by the greedy solvers (see TODO below)
    bce_min, sum_y = hindsight_bce_min(output, labels)
    # TODO(synk): lscp_greedy / mclp_greedy are external, data-dependent greedy
    # set-cover solvers not defined in the reference module; as a deterministic
    # placeholder the greedy upper bound equals sum(labels), so gap == 0.
    greedy_upper_bounds = sum_y
    gap = jnp.abs(sum_y - greedy_upper_bounds)
    return bce_min + gap, greedy_upper_bounds


if __name__ == "__main__":
    key = jax.random.PRNGKey(0)
    k1, k2, k3 = jax.random.split(key, 3)

    def ref_bce_min(out, lab):
        inv_w = out.shape[0] / jnp.sum(lab)
        log_p = jnp.maximum(jnp.log(out), -100.0)
        log_1mp = jnp.maximum(jnp.log(1.0 - out), -100.0)
        bce = -inv_w * (lab[:, None] * log_p + (1.0 - lab[:, None]) * log_1mp)
        return jnp.min(jnp.mean(bce, axis=0))

    # small shapes consistent with the module: N nodes, P probability maps
    N, P = 128, 8
    output = jax.nn.sigmoid(jax.random.normal(k1, (N, P), dtype=jnp.float32))
    labels = (jax.random.uniform(k2, (N,)) < 0.5).astype(jnp.float32)
    labels = labels.at[0].set(1.0)      # BCE weight = N/sum(labels); avoid div-by-0
    A = (jax.random.uniform(k3, (N, N)) < 0.1).astype(jnp.float32)

    loss, ub = hindsight_loss(output, labels, A, problem="lscp")
    jax.block_until_ready((loss, ub))
    ref = ref_bce_min(output, labels)
    assert jnp.allclose(loss, ref, rtol=1e-4, atol=1e-5), (loss, ref)
    assert jnp.allclose(ub, jnp.sum(labels)), (ub, jnp.sum(labels))

    # multi-tile + row-padding path: N not a multiple of the row tile, grid > 1
    N2, P2 = 3000, 8
    out2 = jax.nn.sigmoid(jax.random.normal(k1, (N2, P2), dtype=jnp.float32))
    lab2 = (jax.random.uniform(k2, (N2,)) < 0.3).astype(jnp.float32)
    lab2 = lab2.at[0].set(1.0)
    got2, ysum2 = hindsight_bce_min(out2, lab2, block_rows=64)  # forces 3 grid steps
    jax.block_until_ready((got2, ysum2))
    ref2 = ref_bce_min(out2, lab2)
    assert jnp.allclose(got2, ref2, rtol=1e-4, atol=1e-4), (got2, ref2)
    assert jnp.allclose(ysum2, jnp.sum(lab2)), (ysum2, jnp.sum(lab2))

    # probmap count that does not divide 128 (column-padding path)
    N3, P3 = 200, 5
    out3 = jax.nn.sigmoid(jax.random.normal(k1, (N3, P3), dtype=jnp.float32))
    lab3 = (jax.random.uniform(k2, (N3,)) < 0.4).astype(jnp.float32)
    lab3 = lab3.at[0].set(1.0)
    got3, ysum3 = hindsight_bce_min(out3, lab3)
    jax.block_until_ready((got3, ysum3))
    ref3 = ref_bce_min(out3, lab3)
    assert jnp.allclose(got3, ref3, rtol=1e-4, atol=1e-4), (got3, ref3)
    assert jnp.allclose(ysum3, jnp.sum(lab3)), (ysum3, jnp.sum(lab3))

    print("KERNEL_OK")
</pallas_src>

<mosaic_0001>
module attributes {stable_mosaic.version = 11 : i64} {
  func.func @_hindsight_kernel(%arg0: i32, %arg1: memref<8x128xf32, #tpu.memory_space<vmem>>, %arg2: memref<8x16xf32, #tpu.memory_space<vmem>>, %arg3: memref<16x128xf32, #tpu.memory_space<vmem>>, %arg4: memref<1x1xf32, #tpu.memory_space<vmem>>, %arg5: memref<1x1xf32, #tpu.memory_space<vmem>>, %arg6: memref<1x128xf32, #tpu.memory_space<vmem>>) attributes {dimension_semantics = [#tpu.dimension_semantics<arbitrary>], iteration_bounds = array<i64: 1>, scalar_prefetch = 0 : i64, scratch_operands = 1 : i64, tpu.core_type = #tpu.core_type<tc>, window_params = [{transform_indices = @transform_0, window_bounds = array<i64: 8, 128>}, {transform_indices = @transform_1, window_bounds = array<i64: 8, 16>}, {pipeline_mode = #tpu.pipeline_mode<synchronous>, transform_indices = @transform_2, window_bounds = array<i64: 16, 128>}, {pipeline_mode = #tpu.pipeline_mode<synchronous>, transform_indices = @transform_3, window_bounds = array<i64: 1, 1>}, {pipeline_mode = #tpu.pipeline_mode<synchronous>, transform_indices = @transform_4, window_bounds = array<i64: 1, 1>}]} {
    %c0_i32 = arith.constant 0 : i32
    %0 = arith.cmpi eq, %arg0, %c0_i32 : i32
    %1 = arith.extui %0 : i1 to i32
    %c0_i32_0 = arith.constant 0 : i32
    %2 = arith.cmpi ne, %1, %c0_i32_0 : i32
    scf.if %2 {
      %cst_22 = arith.constant 0.000000e+00 : f32
      %33 = vector.broadcast %cst_22 : f32 to vector<1x128xf32>
      %c0_23 = arith.constant 0 : index
      %c0_24 = arith.constant 0 : index
      %34 = vector.load %arg6[%c0_23, %c0_24] : memref<1x128xf32, #tpu.memory_space<vmem>>, vector<1x128xf32>
      tpu.vector_store %arg6[%c0_23, %c0_24], %33 {strides = array<i32>} : memref<1x128xf32, #tpu.memory_space<vmem>>, vector<1x128xf32>,
      %cst_25 = arith.constant 0.000000e+00 : f32
      %35 = vector.broadcast %cst_25 : f32 to vector<1x1xf32>
      %c0_26 = arith.constant 0 : index
      %c0_27 = arith.constant 0 : index
      %36 = vector.load %arg5[%c0_26, %c0_27] : memref<1x1xf32, #tpu.memory_space<vmem>>, vector<1x1xf32>
      tpu.vector_store %arg5[%c0_26, %c0_27], %35 {strides = array<i32>} : memref<1x1xf32, #tpu.memory_space<vmem>>, vector<1x1xf32>,
      %cst_28 = arith.constant 0.000000e+00 : f32
      %37 = vector.broadcast %cst_28 : f32 to vector<1x1xf32>
      %c0_29 = arith.constant 0 : index
      %c0_30 = arith.constant 0 : index
      %38 = vector.load %arg4[%c0_29, %c0_30] : memref<1x1xf32, #tpu.memory_space<vmem>>, vector<1x1xf32>
      tpu.vector_store %arg4[%c0_29, %c0_30], %37 {strides = array<i32>} : memref<1x1xf32, #tpu.memory_space<vmem>>, vector<1x1xf32>,
    } else {
    }
    %c0 = arith.constant 0 : index
    %c0_1 = arith.constant 0 : index
    %3 = vector.load %arg1[%c0, %c0_1] : memref<8x128xf32, #tpu.memory_space<vmem>>, vector<8x128xf32>
    %c0_2 = arith.constant 0 : index
    %c0_3 = arith.constant 0 : index
    %4 = vector.load %arg2[%c0_2, %c0_3] : memref<8x16xf32, #tpu.memory_space<vmem>>, vector<8x16xf32>
    %c0_4 = arith.constant 0 : index
    %c0_5 = arith.constant 0 : index
    %5 = vector.load %arg3[%c0_4, %c0_5] : memref<16x128xf32, #tpu.memory_space<vmem>>, vector<16x128xf32>
    %cst = arith.constant dense<0.000000e+00> : vector<8x128xf32>
    %6 = tpu.matmul %4, %5, %cst {dimension_numbers = #tpu.dot_dimension_numbers<[1], [0], [0], [1], [0, 0, 1, 1], [], []>} : vector<8x16xf32>, vector<16x128xf32>, vector<8x128xf32> -> vector<8x128xf32>
    %cst_6 = arith.constant 5.000000e-01 : f32
    %7 = vector.broadcast %cst_6 : f32 to vector<8x128xf32>
    %8 = arith.cmpf ogt, %6, %7 : vector<8x128xf32>
    %cst_7 = arith.constant 1.000000e+00 : f32
    %9 = vector.broadcast %cst_7 : f32 to vector<8x128xf32>
    %10 = arith.subf %9, %3 : vector<8x128xf32>
    %11 = arith.select %8, %3, %10 : vector<8x128xi1>, vector<8x128xf32>
    %12 = math.log %11 : vector<8x128xf32>
    %cst_8 = arith.constant -1.000000e+02 : f32
    %13 = vector.broadcast %cst_8 : f32 to vector<8x128xf32>
    %14 = arith.maximumf %12, %13 : vector<8x128xf32>
    %cst_9 = arith.constant 0.000000e+00 : f32
    %15 = vector.broadcast %cst_9 : f32 to vector<8x128xf32>
    %16 = arith.subf %15, %14 : vector<8x128xf32>
    %c0_10 = arith.constant 0 : index
    %c0_11 = arith.constant 0 : index
    %17 = vector.load %arg6[%c0_10, %c0_11] : memref<1x128xf32, #tpu.memory_space<vmem>>, vector<1x128xf32>
    %cst_12 = arith.constant dense<0.000000e+00> : vector<128xf32>
    %18 = vector.multi_reduction <add>, %16, %cst_12 [0] : vector<8x128xf32> to vector<128xf32>
    %19 = vector.shape_cast %18 : vector<128xf32> to vector<1x128xf32>
    %20 = arith.addf %17, %19 : vector<1x128xf32>
    %c0_13 = arith.constant 0 : index
    %c0_14 = arith.constant 0 : index
    %21 = vector.load %arg6[%c0_13, %c0_14] : memref<1x128xf32, #tpu.memory_space<vmem>>, vector<1x128xf32>
    tpu.vector_store %arg6[%c0_13, %c0_14], %20 {strides = array<i32>} : memref<1x128xf32, #tpu.memory_space<vmem>>, vector<1x128xf32>,
    %c0_15 = arith.constant 0 : index
    %c0_16 = arith.constant 0 : index
    %22 = vector.load %arg5[%c0_15, %c0_16] : memref<1x1xf32, #tpu.memory_space<vmem>>, vector<1x1xf32>
    %23 = vector.shape_cast %4 : vector<8x16xf32> to vector<1x8x16xf32>
    %cst_17 = arith.constant dense<0.000000e+00> : vector<1xf32>
    %24 = vector.multi_reduction <add>, %23, %cst_17 [1, 2] : vector<1x8x16xf32> to vector<1xf32>
    %25 = vector.shape_cast %24 : vector<1xf32> to vector<1x1x1xf32>
    %26 = vector.extract %25[0, 0, 0] : f32 from vector<1x1x1xf32>
    %27 = vector.broadcast %26 : f32 to vector<1x1xf32>
    %28 = arith.addf %22, %27 : vector<1x1xf32>
    %c0_18 = arith.constant 0 : index
    %c0_19 = arith.constant 0 : index
    %29 = vector.load %arg5[%c0_18, %c0_19] : memref<1x1xf32, #tpu.memory_space<vmem>>, vector<1x1xf32>
    tpu.vector_store %arg5[%c0_18, %c0_19], %28 {strides = array<i32>} : memref<1x1xf32, #tpu.memory_space<vmem>>, vector<1x1xf32>,
    %c0_i32_20 = arith.constant 0 : i32
    %30 = arith.cmpi eq, %arg0, %c0_i32_20 : i32
    %31 = arith.extui %30 : i1 to i32
    %c0_i32_21 = arith.constant 0 : i32
    %32 = arith.cmpi ne, %31, %c0_i32_21 : i32
    scf.if %32 {
      %c0_22 = arith.constant 0 : index
      %c0_23 = arith.constant 0 : index
      %33 = vector.load %arg6[%c0_22, %c0_23] : memref<1x128xf32, #tpu.memory_space<vmem>>, vector<1x128xf32>
      %c64_i32 = arith.constant 64 : i32
      %34 = tpu.dynamic_rotate %33 by %c64_i32 dim 1 : vector<1x128xf32>, i32 -> vector<1x128xf32>
      %35 = arith.addf %33, %34 : vector<1x128xf32>
      %c32_i32 = arith.constant 32 : i32
      %36 = tpu.dynamic_rotate %35 by %c32_i32 dim 1 : vector<1x128xf32>, i32 -> vector<1x128xf32>
      %37 = arith.addf %35, %36 : vector<1x128xf32>
      %c16_i32 = arith.constant 16 : i32
      %38 = tpu.dynamic_rotate %37 by %c16_i32 dim 1 : vector<1x128xf32>, i32 -> vector<1x128xf32>
      %39 = arith.addf %37, %38 : vector<1x128xf32>
      %c8_i32 = arith.constant 8 : i32
      %40 = tpu.dynamic_rotate %39 by %c8_i32 dim 1 : vector<1x128xf32>, i32 -> vector<1x128xf32>
      %41 = arith.addf %39, %40 : vector<1x128xf32>
      %42 = tpu.iota {dimensions = array<i32: 1>} : vector<1x128xi32>
      %c8_i32_24 = arith.constant 8 : i32
      %43 = vector.broadcast %c8_i32_24 : i32 to vector<1x128xi32>
      %44 = arith.cmpi slt, %42, %43 : vector<1x128xi32>
      %cst_25 = arith.constant 0x7F800000 : f32
      %45 = vector.broadcast %cst_25 : f32 to vector<1x128xf32>
      %46 = arith.select %44, %41, %45 : vector<1x128xi1>, vector<1x128xf32>
      %cst_26 = arith.constant dense<0x7F800000> : vector<1xf32>
      %47 = vector.multi_reduction <minimumf>, %46, %cst_26 [1] : vector<1x128xf32> to vector<1xf32>
      %48 = vector.shape_cast %47 : vector<1xf32> to vector<1x1xf32>
      %c0_27 = arith.constant 0 : index
      %c0_28 = arith.constant 0 : index
      %49 = vector.load %arg5[%c0_27, %c0_28] : memref<1x1xf32, #tpu.memory_space<vmem>>, vector<1x1xf32>
      %50 = arith.divf %48, %49 : vector<1x1xf32>
      %c0_29 = arith.constant 0 : index
      %c0_30 = arith.constant 0 : index
      %51 = vector.load %arg4[%c0_29, %c0_30] : memref<1x1xf32, #tpu.memory_space<vmem>>, vector<1x1xf32>
      tpu.vector_store %arg4[%c0_29, %c0_30], %50 {strides = array<i32>} : memref<1x1xf32, #tpu.memory_space<vmem>>, vector<1x1xf32>,
    } else {
    }
    return
  }
  func.func @transform_0(%arg0: i32) -> (i32, i32) {
    %c0_i32 = arith.constant 0 : i32
    %c0_i32_0 = arith.constant 0 : i32
    return %arg0, %c0_i32 : i32, i32
  }
  func.func @transform_1(%arg0: i32) -> (i32, i32) {
    %c0_i32 = arith.constant 0 : i32
    %c0_i32_0 = arith.constant 0 : i32
    return %arg0, %c0_i32 : i32, i32
  }
  func.func @transform_2(%arg0: i32) -> (i32, i32) {
    %c0_i32 = arith.constant 0 : i32
    %c0_i32_0 = arith.constant 0 : i32
    %c0_i32_1 = arith.constant 0 : i32
    return %c0_i32, %c0_i32_0 : i32, i32
  }
  func.func @transform_3(%arg0: i32) -> (i32, i32) {
    %c0_i32 = arith.constant 0 : i32
    %c0_i32_0 = arith.constant 0 : i32
    %c0_i32_1 = arith.constant 0 : i32
    return %c0_i32, %c0_i32_0 : i32, i32
  }
  func.func @transform_4(%arg0: i32) -> (i32, i32) {
    %c0_i32 = arith.constant 0 : i32
    %c0_i32_0 = arith.constant 0 : i32
    %c0_i32_1 = arith.constant 0 : i32
    return %c0_i32, %c0_i32_0 : i32, i32
  }
}

</mosaic_0001>

<bundles_post_ra>
// kernel: tpu_custom_call.1
= control target key start
LH: loop header
LB: loop body
LE: loop exit
PB: predicated region body
PF: predicated region fallthrough
CT: control target
= control target key end

     0   :  { %10 = vsyncpa [#allocation4], 0  ;;  %s487_s0 = inlined_call_operand.hbm [shape: f32[8,128], index: 0, kind: input, shape index: {}]   ;;  %s488_s1 = inlined_call_operand.hbm [shape: f32[8,16], index: 1, kind: input, shape index: {}]   ;;  %s489_s2 = inlined_call_operand.hbm [shape: f32[16,128], index: 2, kind: input, shape index: {}]   ;;  %s490_s3 = inlined_call_operand.hbm [shape: f32[1,1], index: 3, kind: output, shape index: {0}]   ;;  %s491_s4 = inlined_call_operand.hbm [shape: f32[1,1], index: 4, kind: output, shape index: {1}]  }
   0x1   :  { %11 = vsyncpa [#allocation7], 0 }
   0x2   :  { %12 = vsyncpa [#allocation5], 0 }
   0x3   :  { %13 = vsyncpa [#allocation11], 0  ;;  %s381_s15 = smov [#allocation6]   ;;  %s382_s17 = smov [#allocation3]  }
   0x4   :  { %s30_s16 = sshll.u32 %s381_s15, 4  ;;  %s20_s18 = sshll.u32 %s382_s17, 4  ;;  %s31_s16 = int_to_ptr.vmem [resolvable:$true] %s30_s16  ;;  %s21_s18 = int_to_ptr.vmem [resolvable:$true] %s20_s18 }
   0x5   :  { %s263_s21 = scalar_lea.hbm %s488_s1, 128 }
   0x6   :  { %p264_p0 = scmp.ne.s32.totalorder %s488_s1, %s263_s21  ;;  %p267_p1 = scmp.lt.u32.totalorder %s263_s21, %s488_s1 }
   0x8   :  { %p269_p2 = pnand %p267_p1, %p264_p0 }
   0xa   :  { %272 = shalt.err (!%p269_p2)
}
   0xb   :  { %s273_s26 = scalar_lea.vmem %s31_s16, 128  ;;  %p278_p4 = scmp.lt.s32.totalorder %s31_s16, %s31_s16 }
   0xc   :  { %p274_p3 = scmp.ne.s32.totalorder %s31_s16, %s273_s26  ;;  %p279_p5 = scmp.lt.s32.totalorder %s273_s26, %s273_s26 }
   0xe   :  { %p280_p6 = por %p279_p5, %p278_p4 }
  0x10   :  { %p281_p7 = pnand %p280_p6, %p274_p3 }
  0x12   :  { %284 = shalt.err (!%p281_p7)
}
  0x13   :  { %33 = dma.hbm_to_vmem [thread:$0]  %s488_s1, 128, %s31_s16, [#allocation7]  }
  0x14   :  { %s285_s5 = scalar_lea.hbm %s487_s0, 128 }
  0x15   :  { %p286_p8 = scmp.ne.s32.totalorder %s487_s0, %s285_s5  ;;  %p289_p9 = scmp.lt.u32.totalorder %s285_s5, %s487_s0 }
  0x17   :  { %p291_p10 = pnand %p289_p9, %p286_p8 }
  0x19   :  { %294 = shalt.err (!%p291_p10)
}
  0x1a   :  { %s295_s10 = scalar_lea.vmem %s21_s18, 128  ;;  %p300_p12 = scmp.lt.s32.totalorder %s21_s18, %s21_s18 }
  0x1b   :  { %p296_p11 = scmp.ne.s32.totalorder %s21_s18, %s295_s10  ;;  %p301_p13 = scmp.lt.s32.totalorder %s295_s10, %s295_s10 }
  0x1d   :  { %p302_p0 = por %p301_p13, %p300_p12 }
  0x1f   :  { %p303_p1 = pnand %p302_p0, %p296_p11 }
  0x21   :  { %306 = shalt.err (!%p303_p1)
}
  0x22   :  { %23 = dma.hbm_to_vmem [thread:$0]  %s487_s0, 128, %s21_s18, [#allocation4]  }
  0x23   :  { %s383_s12 = smov [#allocation8]   ;;  %s307_s16 = scalar_lea.hbm %s489_s2, 256 }
  0x24   :  { %s39_s13 = sshll.u32 %s383_s12, 4  ;;  %p308_p2 = scmp.ne.s32.totalorder %s489_s2, %s307_s16  ;;  %s40_s13 = int_to_ptr.vmem [resolvable:$true] %s39_s13 }
  0x25   :  { %p311_p3 = scmp.lt.u32.totalorder %s307_s16, %s489_s2 }
  0x27   :  { %p313_p4 = pnand %p311_p3, %p308_p2 }
  0x29   :  { %316 = shalt.err (!%p313_p4)
}
  0x2a   :  { %s317_s22 = scalar_lea.vmem %s40_s13, 256  ;;  %p322_p6 = scmp.lt.s32.totalorder %s40_s13, %s40_s13 }
  0x2b   :  { %p318_p5 = scmp.ne.s32.totalorder %s40_s13, %s317_s22  ;;  %p323_p7 = scmp.lt.s32.totalorder %s317_s22, %s317_s22 }
  0x2d   :  { %p324_p8 = por %p323_p7, %p322_p6 }
  0x2f   :  { %p325_p9 = pnand %p324_p8, %p318_p5 }
  0x31   :  { %328 = shalt.err (!%p325_p9)
}
  0x32   :  { %s384_s0 = smov 128   ;;  %s385_s18 = smov 8  }
  0x33   :  { %45 = dma.hbm_to_vmem [thread:$0]  %s489_s2, 256, %s40_s13, [#allocation7], %s384_s0, %s384_s0, %s385_s18  }
  0x34   :  { %373 = dma.done.wait [#allocation4], 128  }
  0x35   :  { %374 = vsyncadd [#allocation4], 4294967168 }
  0x36   :  { %375 = dma.done.wait [#allocation7], 384  }
  0x37   :  { %376 = vsyncadd [#allocation7], 4294966912  ;;  %v386_v0 = vmov 0.0|0.0   ;;  %v387_v1 = vmov 0.0   ;;  %vm388_vm0 = vmmov 0   ;;  %v65_v2 = vld [vmem:[#allocation8] sm:$0xff]  ;;  %v188_v38 = vlaneseq }
  0x38   :  { %241 = vmatprep.subr.bf16.mxu0 %v386_v0  ;;  %59 = vst [vmem:[#allocation2] sm:$0x1] %v387_v1  ;;  %238 = vmatprep.mubr.msk.f32.mxu0 %vm388_vm0, %v387_v1  ;;  %v66_v3 = vld [vmem:[#allocation8 + $0x8] sm:$0xff]  ;;  %v64_v5 = vld [vmem:[#allocation6] sm:$0xff]  ;;  %vm67_vm1 = vcmask 130048   ;;  %v63_v6 = vld [vmem:[#allocation3] sm:$0xff] }
  0x39   :  { %v242_v4 = vpack.c.bf16 %v66_v3, %v65_v2  ;;  %v142_v7 = vsub.f32 1.0, %v63_v6  ;;  %s389_s2 = smov 64   ;;  %s390_s25 = smov 32   ;;  %v158_v28 = vsel %vm67_vm1, %v64_v5, 0.0  ;;  %vm60_vm3 = vcmask 0  }
  0x3a   :  { %s391_s26 = smov 16   ;;  %61 = vst.msk [vmem:[#allocation10] sm:$0x1] %vm60_vm3, %v387_v1  ;;  %62 = vst.msk [vmem:[#allocation9] sm:$0x1] %vm60_vm3, %v387_v1  ;;  %v189_v39 = vand.u32 127, %v188_v38 }
  0x3b   :  { %243 = vmatpush3.bf16.msra.mxu0 %v242_v4  ;;  %vm192_vm5 = vcmask 1040384   ;;  %s392_s28 = smov [#allocation10]  }
  0x3c   :  { %vm190_vm4 = vcmp.lt.s32.totalorder %v189_v39, 8  ;;  %s216_s29 = sshll.u32 %s392_s28, 4  ;;  %s217_s29 = int_to_ptr.vmem [resolvable:$true] %s216_s29 }
  0x3d   :  { %s329_s30 = scalar_lea.vmem %s217_s29, 16  ;;  %s333_s5 = scalar_lea.vmem %s217_s29, 32 }
  0x3e   :  { %239 = vmatmul.mubr.msk.f32.vlgmr.msra.gmra.mrb[0].mxu0 %vm67_vm1, %v64_v5  ;;  %p330_p10 = scmp.ne.s32.totalorder %s217_s29, %s329_s30  ;;  %p334_p11 = scmp.lt.s32.totalorder %s217_s29, %s217_s29 }
  0x3f   :  { %v148_v20 = vld [vmem:[#allocation2] sm:$0x1]  ;;  %p335_p12 = scmp.lt.s32.totalorder %s333_s5, %s329_s30 }
  0x41   :  { %v157_v44 = vld [vmem:[#allocation10] sm:$0x1]  ;;  %p336_p13 = por %p335_p12, %p334_p11 }
  0x43   :  { %p337_p0 = pnand %p336_p13, %p330_p10 }
 0x111   :  { %v137_v8 = vpop.f32.mrb[0].mxu0 }
 0x112   :  { %vm141_vm2 = vcmp.gt.f32.partialorder %v137_v8, 0.5  ;;  %v240_v9 = vpop.f32.mrb[1].mxu0 }
 0x113   :  { %v143_v10 = vsel %vm141_vm2, %v63_v6, %v142_v7 }
 0x114   :  { %259 = vlog2.f32 %v143_v10 }
 0x11e   :  { %v260_v11 = vpop.eup %259 }
 0x11f   :  { %v145_v12 = vmul.f32 0.6931472, %v260_v11 }
 0x121   :  { %v146_v13 = vmax.f32 %v145_v12, -100.0 }
 0x123   :  { %v147_v14 = vsub.f32 0.0, %v146_v13 }
 0x125   :  { %v149_v15 = vrot.slane %v147_v14, 4 }
 0x127   :  { %v150_v16 = vadd.f32 %v149_v15, %v147_v14 }
 0x129   :  { %v151_v17 = vrot.slane %v150_v16, 2 }
 0x12b   :  { %v152_v18 = vadd.f32 %v151_v17, %v150_v16 }
 0x12d   :  { %v153_v19 = vrot.slane %v152_v18, 1 }
 0x12f   :  { %v154_v21 = vadd.f32 %v153_v19, %v152_v18 }
 0x131   :  { %v155_v22 = vadd.f32 %v154_v21, %v148_v20 }
 0x133   :  { %156 = vst [vmem:[#allocation2] sm:$0x1] %v155_v22 }
 0x13a   :  { %v175_v23 = vld [vmem:[#allocation2] sm:$0x1] }
 0x13b   :  { %176 = vrot.lane.b32.xlu0 %v175_v23, %s389_s2 }
 0x1ad   :  { %v177_v24 = vpop.permute.xlu0 %176 }
 0x1ae   :  { %v178_v25 = vadd.f32 %v177_v24, %v175_v23 }
 0x1b0   :  { %179 = vrot.lane.b32.xlu0 %v178_v25, %s390_s25 }
 0x222   :  { %v180_v26 = vpop.permute.xlu0 %179 }
 0x223   :  { %v181_v27 = vadd.f32 %v180_v26, %v178_v25 }
 0x225   :  { %182 = vrot.lane.b32.xlu1 %v181_v27, %s391_s26 }
 0x249   :  { %159 = vadd.xlane.f32.xlu1 %v158_v28 }
 0x297   :  { %v183_v29 = vpop.permute.xlu1 %182 }
 0x298   :  { %v184_v30 = vadd.f32 %v183_v29, %v181_v27 }
 0x29a   :  { %185 = vrot.lane.b32.xlu0 %v184_v30, %s385_s18 }
 0x2d6   :  { %v160_v31 = vpop.xlane.xlu1 %159 }
 0x2d7   :  { %v161_v32 = vrot.slane %v160_v31, 4 }
 0x2d9   :  { %v162_v33 = vadd.f32 %v161_v32, %v160_v31 }
 0x2db   :  { %v163_v34 = vrot.slane %v162_v33, 2 }
 0x2dd   :  { %v164_v35 = vadd.f32 %v163_v34, %v162_v33 }
 0x2df   :  { %v165_v36 = vrot.slane %v164_v35, 1 }
 0x2e1   :  { %v166_v37 = vadd.f32 %v165_v36, %v164_v35 }
 0x2e3   :  { %244 = vpush %v166_v37 }
 0x30c   :  { %v186_v40 = vpop.permute.xlu0 %185 }
 0x30d   :  { %v187_v41 = vadd.f32 %v186_v40, %v184_v30 }
 0x30f   :  { %v191_v42 = vsel %vm190_vm4, %v187_v41, inf }
 0x310   :  { %v193_v43 = vsel %vm192_vm5, %v191_v42, inf }
 0x311   :  { %194 = vmin.xlane.f32.xlu0 %v193_v43 }
 0x314   :  { %s245_s27 = spop %244 }
 0x315   :  { %v168_v45 = vstv %s245_s27 }
 0x316   :  { %v169_v46 = vadd.f32 %v168_v45, %v157_v44 }
 0x318   :  { %171 = vst.msk [vmem:[#allocation10] sm:$0x1] %vm60_vm3, %v169_v46 }
 0x319   :  { %340 = shalt.err (!%p337_p0)
}
 0x31a   :  { %s341_s8 = scalar_lea.hbm %s491_s4, 16 }
 0x31b   :  { %p342_p1 = scmp.ne.s32.totalorder %s491_s4, %s341_s8  ;;  %p345_p2 = scmp.lt.u32.totalorder %s341_s8, %s491_s4 }
 0x31d   :  { %p347_p3 = pnand %p345_p2, %p342_p1 }
 0x31f   :  { %350 = shalt.err (!%p347_p3)
}
 0x320   :  { %219 = dma.vmem_to_hbm [thread:$0]  %s217_s29, 16, %s491_s4, [#allocation11]   ;;  %v196_v47 = vld [vmem:[#allocation10] sm:$0x1] }
 0x321   :  { %261 = vrcp.f32 %v196_v47  ;;  %s393_s14 = smov [#allocation9]  }
 0x322   :  { %s206_s15 = sshll.u32 %s393_s14, 4  ;;  %s207_s15 = int_to_ptr.vmem [resolvable:$true] %s206_s15 }
 0x323   :  { %s351_s16 = scalar_lea.vmem %s207_s15, 16  ;;  %s355_s17 = scalar_lea.vmem %s207_s15, 32 }
 0x324   :  { %p352_p4 = scmp.ne.s32.totalorder %s207_s15, %s351_s16  ;;  %p356_p5 = scmp.lt.s32.totalorder %s207_s15, %s207_s15 }
 0x325   :  { %p357_p6 = scmp.lt.s32.totalorder %s355_s17, %s351_s16 }
 0x327   :  { %p358_p7 = por %p357_p6, %p356_p5 }
 0x329   :  { %p359_p8 = pnand %p358_p7, %p352_p4 }
 0x32b   :  { %v262_v48 = vpop.eup %261 }
 0x39e   :  { %v195_v49 = vpop.xlane.xlu0 %194 }
 0x39f   :  { %v198_v50 = vmul.f32 %v262_v48, %v195_v49 }
 0x3a1   :  { %199 = vst.msk [vmem:[#allocation9] sm:$0x1] %vm60_vm3, %v198_v50 }
 0x3a2   :  { %362 = shalt.err (!%p359_p8)
}
 0x3a3   :  { %s363_s20 = scalar_lea.hbm %s490_s3, 16 }
 0x3a4   :  { %p364_p9 = scmp.ne.s32.totalorder %s490_s3, %s363_s20  ;;  %p367_p10 = scmp.lt.u32.totalorder %s363_s20, %s490_s3 }
 0x3a6   :  { %p369_p11 = pnand %p367_p10, %p364_p9 }
 0x3a8   :  { %372 = shalt.err (!%p369_p11)
}
 0x3a9   :  { %209 = dma.vmem_to_hbm [thread:$0]  %s207_s15, 16, %s490_s3, [#allocation5]  }
 0x3aa   :  { %377 = dma.done.wait [#allocation5], 16  }
 0x3ab   :  { %378 = vsyncadd [#allocation5], 4294967280 }
 0x3ac   :  { %379 = dma.done.wait [#allocation11], 16  }
 0x3ad   :  { %380 = vsyncadd [#allocation11], 4294967280 }
 0x3ae   :  { %226 = vsyncpa [#allocation4], 1 }
 0x3af   :  { %227 = vsyncpa [#allocation7], 1 }
 0x3b0   :  { %228 = vsyncpa [#allocation5], 1 }
 0x3b1   :  { %229 = vsyncpa [#allocation11], 1 }

</bundles_post_ra>
